<compile_context>
chip_gen: v6e
topology: v6e:2x2x1
jax: 0.10.0
libtpu: 0.0.40
codegen_flags: <defaults>
</compile_context>

<pallas_src>
import functools

import jax
import jax.numpy as jnp
from jax.experimental import pallas as pl
from jax.experimental.pallas import tpu as pltpu


def _recurrent_cycle_kernel(idx_ref, win_ref, out_ref, *, batch_block):
    # idx_ref : SMEM (batch_pad,) int32 -- scalar-prefetched, pre-modded starts
    # win_ref : VMEM (cycle_len, LC_pad) -- resident lane-dense window table
    # out_ref : VMEM (batch_block, LC_pad)
    g = pl.program_id(0)

    def body(i, carry):
        start = idx_ref[g * batch_block + i]
        # One full, lane-dense row per batch element == the modular gather.
        out_ref[pl.ds(i, 1), :] = win_ref[pl.ds(start, 1), :]
        return carry

    # Capped unroll: keeps LLO scheduling visibility without vreg blowup when
    # batch_block is large.
    jax.lax.fori_loop(0, batch_block, body, 0, unroll=min(batch_block, 8))


def _num_tensorcores():
    """2 for megacore-style chips (v7x), else 1 (v5e/v6e)."""
    try:
        kind = jax.devices()[0].device_kind.lower()
        if "v7" in kind or "7x" in kind:
            return 2
    except Exception:
        pass
    return 1


def _pick_batch_block(batch, row_bytes, *, num_cores=1,
                      vmem_budget_bytes=8 << 20,
                      min_per_core_bytes=512 << 10,
                      sublane=8):
    """Rows per grid step.

    - Double-buffered output block must fit the VMEM budget (row_bytes is the
      lane-padded row size, so the accounting matches the real footprint).
    - Split into >=2 grid steps only on 2-TC chips, and only when each half
      writes enough (>= min_per_core_bytes) to pay for the extra grid step.
    - If more than one block is needed, align the block to the sublane tile.
    """
    bb = max(1, min(batch, vmem_budget_bytes // max(1, 2 * row_bytes)))
    if num_cores >= 2 and batch >= 2:
        half = -(-batch // 2)
        if half * row_bytes >= min_per_core_bytes:
            bb = min(bb, half)
    if bb < batch:
        bb = max(sublane, (bb // sublane) * sublane)
    return int(bb)


def build_cycle_window(data, length):
    """Precompute the lane-dense window table (hoist out of the hot path).

    data: (cycle_len, C).  Row s of the result is
    flatten(data[(s .. s+length-1) % cycle_len]); last dim padded to a
    multiple of 128 lanes.
    """
    cycle_len, channels = data.shape
    rows = (jnp.arange(cycle_len)[:, None] + jnp.arange(length)[None, :]) % cycle_len
    win = data[rows].reshape(cycle_len, length * channels)
    lc = length * channels
    lc_pad = -(-lc // 128) * 128
    if lc_pad != lc:
        win = jnp.pad(win, ((0, 0), (0, lc_pad - lc)))
    return win


def recurrent_cycle_forward(index, data, length, *, window=None, batch_block=None):
    """index: (B,) int, data: (cycle_len, C) -> (B, length, C)."""
    cycle_len, channels = data.shape
    batch = index.shape[0]
    itemsize = jnp.dtype(data.dtype).itemsize
    lc = length * channels

    # Window table: build here if the caller did not precompute it with the
    # parameter (model state).
    if window is None:
        window = build_cycle_window(data, length)
    table_rows, lc_pad = window.shape

    # Matches torch '%' semantics for a positive modulus (non-negative result);
    # done once on the (B,) vector, not per element inside the kernel.
    start_rows = index.astype(jnp.int32) % jnp.int32(cycle_len)

    row_bytes = lc_pad * itemsize
    sublane = 8 * max(1, 4 // itemsize)  # f32:8, bf16:16, int8:32
    if batch_block is None:
        batch_block = _pick_batch_block(
            batch, row_bytes, num_cores=_num_tensorcores(), sublane=sublane
        )
    batch_block = max(1, min(int(batch_block), batch))

    # Pad batch to a multiple of batch_block (pad rows read row 0; sliced off).
    num_blocks = -(-batch // batch_block)
    batch_pad = num_blocks * batch_block
    if batch_pad != batch:
        start_rows = jnp.pad(start_rows, (0, batch_pad - batch))

    # Explicit VMEM sizing: resident table + double-buffered output block,
    # plus slack.  Keeps headroom on v7x (64 MiB physical / 32 MiB scoped).
    table_bytes = table_rows * lc_pad * itemsize
    out_block_bytes = batch_block * row_bytes
    vmem_limit = int(min(48 << 20,
                         max(table_bytes + 2 * out_block_bytes + (2 << 20),
                             16 << 20)))

    kernel = functools.partial(_recurrent_cycle_kernel, batch_block=batch_block)

    out = pl.pallas_call(
        kernel,
        out_shape=jax.ShapeDtypeStruct((batch_pad, lc_pad), data.dtype),
        grid_spec=pltpu.PrefetchScalarGridSpec(
            num_scalar_prefetch=1,
            grid=(num_blocks,),
            in_specs=[
                # Constant block index -> fetched once, resident across steps.
                pl.BlockSpec((table_rows, lc_pad), lambda g, idx: (0, 0)),
            ],
            out_specs=pl.BlockSpec((batch_block, lc_pad), lambda g, idx: (g, 0)),
        ),
        compiler_params=pltpu.CompilerParams(
            dimension_semantics=("parallel",),
            vmem_limit_bytes=vmem_limit,
        ),
    )(start_rows, window)

    # Drop batch / lane padding and restore (B, L, C); row-major, cheap.
    return out[:batch, :lc].reshape(batch, length, channels)


if __name__ == "__main__":
    cycle_len = 16
    channel_size = 32
    batch = 4
    length = 24  # > cycle_len so the modular wrap-around is exercised

    key = jax.random.PRNGKey(0)
    k_data, k_idx = jax.random.split(key)
    # The nn.Parameter is zeros in the module; random values are used here so
    # the gather is actually checked.
    data = jax.random.normal(k_data, (cycle_len, channel_size), dtype=jnp.float32)
    index = jax.random.randint(k_idx, (batch,), 0, cycle_len, dtype=jnp.int32)

    # Hoisted table build (would live next to the parameter in a real model).
    window = build_cycle_window(data, length)

    out = recurrent_cycle_forward(index, data, length, window=window)
    out = jax.block_until_ready(out)

    # Pure-JAX reference (mirrors the PyTorch forward exactly).
    gather_index = (index[:, None] + jnp.arange(length)[None, :]) % cycle_len
    ref = data[gather_index]

    assert out.shape == (batch, length, channel_size)
    assert jnp.allclose(out, ref, atol=1e-6), "mismatch vs reference"
    print("KERNEL_OK")
</pallas_src>

<mosaic_0001>
module attributes {stable_mosaic.version = 11 : i64} {
  func.func @_recurrent_cycle_kernel(%arg0: i32, %arg1: memref<4xi32, #tpu.memory_space<smem>>, %arg2: memref<16x768xf32, #tpu.memory_space<vmem>>, %arg3: memref<4x768xf32, #tpu.memory_space<vmem>>) attributes {dimension_semantics = [#tpu.dimension_semantics<parallel>], iteration_bounds = array<i64: 1>, scalar_prefetch = 1 : i64, scratch_operands = 0 : i64, tpu.core_type = #tpu.core_type<tc>, window_params = [{pipeline_mode = #tpu.pipeline_mode<synchronous>, transform_indices = @transform_0, window_bounds = array<i64: 16, 768>}, {transform_indices = @transform_1, window_bounds = array<i64: 4, 768>}]} {
    %c0_i32 = arith.constant 0 : i32
    %c4_i32 = arith.constant 4 : i32
    %0 = arith.muli %arg0, %c4_i32 : i32
    %1 = arith.addi %0, %c0_i32 : i32
    %2 = arith.index_cast %1 : i32 to index
    %3 = memref.load %arg1[%2] : memref<4xi32, #tpu.memory_space<smem>>
    %4 = arith.index_cast %3 : i32 to index
    %c0 = arith.constant 0 : index
    %5 = vector.load %arg2[%4, %c0] : memref<16x768xf32, #tpu.memory_space<vmem>>, vector<1x768xf32>
    %6 = arith.index_cast %c0_i32 : i32 to index
    %c0_0 = arith.constant 0 : index
    %7 = vector.load %arg3[%6, %c0_0] : memref<4x768xf32, #tpu.memory_space<vmem>>, vector<1x768xf32>
    tpu.vector_store %arg3[%6, %c0_0], %5 {strides = array<i32>} : memref<4x768xf32, #tpu.memory_space<vmem>>, vector<1x768xf32>,
    %c1_i32 = arith.constant 1 : i32
    %c4_i32_1 = arith.constant 4 : i32
    %8 = arith.muli %arg0, %c4_i32_1 : i32
    %9 = arith.addi %8, %c1_i32 : i32
    %10 = arith.index_cast %9 : i32 to index
    %11 = memref.load %arg1[%10] : memref<4xi32, #tpu.memory_space<smem>>
    %12 = arith.index_cast %11 : i32 to index
    %c0_2 = arith.constant 0 : index
    %13 = vector.load %arg2[%12, %c0_2] : memref<16x768xf32, #tpu.memory_space<vmem>>, vector<1x768xf32>
    %14 = arith.index_cast %c1_i32 : i32 to index
    %c0_3 = arith.constant 0 : index
    %15 = vector.load %arg3[%14, %c0_3] : memref<4x768xf32, #tpu.memory_space<vmem>>, vector<1x768xf32>
    tpu.vector_store %arg3[%14, %c0_3], %13 {strides = array<i32>} : memref<4x768xf32, #tpu.memory_space<vmem>>, vector<1x768xf32>,
    %c2_i32 = arith.constant 2 : i32
    %c4_i32_4 = arith.constant 4 : i32
    %16 = arith.muli %arg0, %c4_i32_4 : i32
    %17 = arith.addi %16, %c2_i32 : i32
    %18 = arith.index_cast %17 : i32 to index
    %19 = memref.load %arg1[%18] : memref<4xi32, #tpu.memory_space<smem>>
    %20 = arith.index_cast %19 : i32 to index
    %c0_5 = arith.constant 0 : index
    %21 = vector.load %arg2[%20, %c0_5] : memref<16x768xf32, #tpu.memory_space<vmem>>, vector<1x768xf32>
    %22 = arith.index_cast %c2_i32 : i32 to index
    %c0_6 = arith.constant 0 : index
    %23 = vector.load %arg3[%22, %c0_6] : memref<4x768xf32, #tpu.memory_space<vmem>>, vector<1x768xf32>
    tpu.vector_store %arg3[%22, %c0_6], %21 {strides = array<i32>} : memref<4x768xf32, #tpu.memory_space<vmem>>, vector<1x768xf32>,
    %c3_i32 = arith.constant 3 : i32
    %c4_i32_7 = arith.constant 4 : i32
    %24 = arith.muli %arg0, %c4_i32_7 : i32
    %25 = arith.addi %24, %c3_i32 : i32
    %26 = arith.index_cast %25 : i32 to index
    %27 = memref.load %arg1[%26] : memref<4xi32, #tpu.memory_space<smem>>
    %28 = arith.index_cast %27 : i32 to index
    %c0_8 = arith.constant 0 : index
    %29 = vector.load %arg2[%28, %c0_8] : memref<16x768xf32, #tpu.memory_space<vmem>>, vector<1x768xf32>
    %30 = arith.index_cast %c3_i32 : i32 to index
    %c0_9 = arith.constant 0 : index
    %31 = vector.load %arg3[%30, %c0_9] : memref<4x768xf32, #tpu.memory_space<vmem>>, vector<1x768xf32>
    tpu.vector_store %arg3[%30, %c0_9], %29 {strides = array<i32>} : memref<4x768xf32, #tpu.memory_space<vmem>>, vector<1x768xf32>,
    %c4_i32_10 = arith.constant 4 : i32
    return
  }
  func.func @transform_0(%arg0: i32, %arg1: memref<4xi32, #tpu.memory_space<smem>>) -> (i32, i32) {
    %c0_i32 = arith.constant 0 : i32
    %c0_i32_0 = arith.constant 0 : i32
    %c0_i32_1 = arith.constant 0 : i32
    return %c0_i32, %c0_i32_0 : i32, i32
  }
  func.func @transform_1(%arg0: i32, %arg1: memref<4xi32, #tpu.memory_space<smem>>) -> (i32, i32) {
    %c0_i32 = arith.constant 0 : i32
    %c0_i32_0 = arith.constant 0 : i32
    return %arg0, %c0_i32 : i32, i32
  }
}

</mosaic_0001>

<bundles_post_ra>
// kernel: tpu_custom_call.1
= control target key start
LH: loop header
LB: loop body
LE: loop exit
PB: predicated region body
PF: predicated region fallthrough
CT: control target
= control target key end

     0   :  { %s184_s9 = smov [#allocation3]   ;;  %s233_s0 = inlined_call_operand.hbm [shape: s32[4], index: 0, kind: input, shape index: {}]   ;;  %s234_s1 = inlined_call_operand.hbm [shape: f32[16,768], index: 1, kind: input, shape index: {}]   ;;  %s235_s2 = inlined_call_operand.hbm [shape: f32[4,768], index: 2, kind: output, shape index: {}]  }
   0x1   :  { %8 = dma.hbm_to_smem %s233_s0, 16, %s184_s9, [#allocation2] }
   0x2   :  { %178 = dma.done.wait [#allocation2], 16 }
   0x3   :  { %179 = vsyncadd [#allocation2], 4294967280 }
   0x4   :  { %10 = sfence }
   0x5   :  { %11 = vsyncpa [#allocation5], 0 }
   0x6   :  { %12 = vsyncpa [#allocation6], 0  ;;  %s185_s12 = smov [#allocation4]  }
   0x7   :  { %s18_s13 = sshll.u32 %s185_s12, 4  ;;  %s19_s13 = int_to_ptr.vmem [resolvable:$true] %s18_s13 }
   0x8   :  { %s146_s14 = scalar_lea.vmem %s19_s13, 1536  ;;  %p151_p1 = scmp.lt.s32.totalorder %s19_s13, %s19_s13 }
   0x9   :  { %p147_p0 = scmp.ne.s32.totalorder %s19_s13, %s146_s14  ;;  %p152_p2 = scmp.lt.s32.totalorder %s146_s14, %s146_s14 }
   0xb   :  { %p153_p3 = por %p152_p2, %p151_p1 }
   0xd   :  { %p154_p4 = pnand %p153_p3, %p147_p0 }
   0xf   :  { %157 = shalt.err (!%p154_p4)
}
  0x10   :  { %s186_s15 = smov 768   ;;  %s187_s16 = smov 48  }
  0x11   :  { %24 = dma.hbm_to_vmem [thread:$0]  %s234_s1, 1536, %s19_s13, [#allocation5], %s186_s15, %s186_s15, %s187_s16  }
  0x12   :  { %180 = dma.done.wait [#allocation5], 1536  }
  0x13   :  { %181 = vsyncadd [#allocation5], 4294965760  ;;  %s29_s0 = sld [smem:[#allocation3]]  ;;  %v41_v0 = vlaneseq  ;;  %s188_s10 = smov [#allocation7]  }
  0x14   :  { %s119_s19 = sld [smem:[#allocation3 + $0x1]]  ;;  %s97_s11 = sshll.u32 %s188_s10, 4  ;;  %s98_s11 = int_to_ptr.vmem [resolvable:$true] %s97_s11 }
  0x15   :  { %s210_s20 = sld [smem:[#allocation3 + $0x2]]  ;;  %vm215_vm0 = vcmp.lt.s32.totalorder %v41_v0, 768  ;;  %s158_s15 = scalar_lea.vmem %s98_s11, 384 }
  0x16   :  { %s212_s21 = sld [smem:[#allocation3 + $0x3]]  ;;  %p159_p5 = scmp.ne.s32.totalorder %s98_s11, %s158_s15 }
  0x17   :  { %p163_p6 = scmp.lt.s32.totalorder %s98_s11, %s98_s11  ;;  %p164_p7 = scmp.lt.s32.totalorder %s158_s15, %s158_s15 }
  0x19   :  { %s30_s22 = sshra.s32 %s29_s0, 3  ;;  %s33_s23 = sand.u32 7, %s29_s0 }
  0x1a   :  { %s118_s24 = smul.u32 48, %s30_s22  ;;  %s48_s25 = sshra.s32 %s119_s19, 3 }
  0x1b   :  { %s51_s26 = sand.u32 7, %s119_s19  ;;  %s120_s27 = smul.u32 48, %s48_s25 }
  0x1c   :  { %s36_s28 = sadd.s32 %s118_s24, %s33_s23  ;;  %s63_s1 = sshra.s32 %s210_s20, 3 }
  0x1d   :  { %s54_s29 = sadd.s32 %s120_s27, %s51_s26  ;;  %s37_s30 = scalar_lea.vmem [#allocation4], %s36_s28 }
  0x1e   :  { %v38_v2 = vld [vmem:[%s37_s30] ss:$8 sm:$0xf]  ;;  %s66_s3 = sand.u32 7, %s210_s20  ;;  %s55_s4 = scalar_lea.vmem [#allocation4], %s54_s29 }
  0x1f   :  { %v39_v3 = vld [vmem:[%s37_s30] ss:$8 sm:$0x30]  ;;  %s122_s5 = smul.u32 48, %s63_s1  ;;  %s78_s6 = sshra.s32 %s212_s21, 3 }
  0x20   :  { %v40_v4 = vor.u32 %v39_v3, %v38_v2  ;;  %v56_v5 = vld [vmem:[%s55_s4] ss:$8 sm:$0xf]  ;;  %s81_s7 = sand.u32 7, %s212_s21  ;;  %s124_s8 = smul.u32 48, %s78_s6 }
  0x21   :  { %v57_v6 = vld [vmem:[%s55_s4] ss:$8 sm:$0x30]  ;;  %s69_s9 = sadd.s32 %s122_s5, %s66_s3  ;;  %p165_p8 = por %p164_p7, %p163_p6 }
  0x22   :  { %45 = vst.msk [vmem:[#allocation7] ss:$4 sm:$0x3f] %vm215_vm0, %v40_v4  ;;  %v58_v7 = vor.u32 %v57_v6, %v56_v5  ;;  %s84_s12 = sadd.s32 %s124_s8, %s81_s7  ;;  %s70_s13 = scalar_lea.vmem [#allocation4], %s69_s9 }
  0x23   :  { %v71_v8 = vld [vmem:[%s70_s13] ss:$8 sm:$0xf]  ;;  %s85_s14 = scalar_lea.vmem [#allocation4], %s84_s12  ;;  %p166_p9 = pnand %p165_p8, %p159_p5 }
  0x24   :  { %60 = vst.msk [vmem:[#allocation7 + $0x1] ss:$4 sm:$0x3f] %vm215_vm0, %v58_v7  ;;  %v72_v9 = vld [vmem:[%s70_s13] ss:$8 sm:$0x30] }
  0x25   :  { %v73_v10 = vor.u32 %v72_v9, %v71_v8  ;;  %v86_v11 = vld [vmem:[%s85_s14] ss:$8 sm:$0xf] }
  0x26   :  { %v87_v12 = vld [vmem:[%s85_s14] ss:$8 sm:$0x30] }
  0x27   :  { %75 = vst.msk [vmem:[#allocation7 + $0x2] ss:$4 sm:$0x3f] %vm215_vm0, %v73_v10  ;;  %v88_v13 = vor.u32 %v87_v12, %v86_v11 }
  0x29   :  { %90 = vst.msk [vmem:[#allocation7 + $0x3] ss:$4 sm:$0x3f] %vm215_vm0, %v88_v13 }
  0x2a   :  { %169 = shalt.err (!%p166_p9)
}
  0x2b   :  { %100 = dma.vmem_to_hbm [thread:$0]  %s98_s11, 384, %s235_s2, [#allocation6]  }
  0x2c   :  { %182 = dma.done.wait [#allocation6], 384  }
  0x2d   :  { %183 = vsyncadd [#allocation6], 4294966912 }
  0x2e   :  { %104 = vsyncpa [#allocation5], 1 }
  0x2f   :  { %105 = vsyncpa [#allocation6], 1 }

</bundles_post_ra>
